<compile_context>
chip_gen: v7x
topology: tpu7x:2x2x1
jax: 0.10.0
libtpu: 0.0.40
codegen_flags: <defaults>
</compile_context>

<pallas_src>
import functools

import jax
import jax.numpy as jnp
from jax.experimental import pallas as pl
from jax.experimental.pallas import tpu as pltpu

_LANE = 128


# ----------------------------- kernels -------------------------------------


def _ln_rowwise_kernel(alpha_ref, bias_ref, x_ref, o_ref, *, eps, d):
    """LayerNorm over the last axis; one logical row per tile row."""
    x = x_ref[...].astype(jnp.float32)
    mean = jnp.sum(x, axis=-1, keepdims=True) * (1.0 / d)
    c = x - mean
    # Two-pass (centered) variance avoids catastrophic cancellation; the tile
    # is resident so the extra XLU reduction is free for a mem-bound op.
    var = jnp.sum(c * c, axis=-1, keepdims=True) * (1.0 / (d - 1))  # ddof=1
    std = jnp.sqrt(jnp.maximum(var, 0.0))
    scale = alpha_ref[0] * pl.reciprocal(std + eps, approx=False)
    o_ref[...] = (c * scale + bias_ref[0]).astype(o_ref.dtype)


def _ln_folded_kernel(alpha_ref, bias_ref, seg_ref, x_ref, o_ref, *, eps, d):
    """LayerNorm with 128 // d logical rows folded into the lane axis.

    Each (block_rows, 128) tile row holds 128//d independent d-wide segments.
    Segmented sum + broadcast is a single MXU matmul against a block-diagonal
    ones matrix, so every vreg and every store stays lane-dense (unmasked vst).
    """
    x = x_ref[...].astype(jnp.float32)
    seg = seg_ref[...]
    mean = jnp.dot(x, seg, preferred_element_type=jnp.float32) * (1.0 / d)
    c = x - mean
    var = jnp.dot(c * c, seg, preferred_element_type=jnp.float32) * (1.0 / (d - 1))
    std = jnp.sqrt(jnp.maximum(var, 0.0))
    scale = alpha_ref[0] * pl.reciprocal(std + eps, approx=False)
    o_ref[...] = (c * scale + bias_ref[0]).astype(o_ref.dtype)


# --------------------------- tiling heuristics ------------------------------


def _tpu_generation():
    """Best-effort TPU generation from device_kind (e.g. 'TPU v6 lite' -> 6)."""
    try:
        kind = jax.devices()[0].device_kind.lower()
    except Exception:
        return None
    for g in (7, 6, 5, 4):
        if f"v{g}" in kind or f"tpu{g}" in kind:
            return g
    return None


def _hw_config():
    gen = _tpu_generation()
    if gen is not None and gen < 7:
        # v4/v5e/v6e: 128 MiB VMEM, single TensorCore -> fewest, largest tiles;
        # no grid-step floor (the grid is a serial loop there).
        return dict(tile_budget=24 << 20, target_rows=2048,
                    vmem_limit=64 << 20, step_floor=None)
    # v7x (64 MiB VMEM, 2 TensorCores) or unknown: conservative tile budget and
    # keep enough grid steps so both cores get work under ("parallel",).
    return dict(tile_budget=8 << 20, target_rows=1024,
                vmem_limit=32 << 20, step_floor=8)


def _pick_block_rows(rows, lane_d, itemsize, cfg):
    """Row-tile size: biggest that fits the VMEM budget, sublane-aligned."""
    row_mult = {4: 8, 2: 16, 1: 32}.get(itemsize, 8)
    # Double-buffered input + output tiles plus ~3 row-sized f32 temporaries.
    per_row_bytes = 4 * lane_d * itemsize + 3 * lane_d * 4
    cap = max(row_mult,
              (cfg["tile_budget"] // per_row_bytes) // row_mult * row_mult)
    br = min(cfg["target_rows"], cap)
    br = max(row_mult, (br // row_mult) * row_mult)

    floor = cfg["step_floor"]
    if floor is not None and rows > 2 * 128 and pl.cdiv(rows, br) < floor:
        # v7x only: give both TensorCores work, but never drop below 128 rows
        # per tile (per-step overhead dominates below that).
        balanced = pl.cdiv(pl.cdiv(rows, floor), row_mult) * row_mult
        br = min(br, max(balanced, 128))

    if br >= rows:
        return rows  # single full-extent block (always a legal block shape)
    return br


def _segment_matrix(d):
    """(128, 128) block-diagonal ones: 1 where lanes i, j share a d-wide group."""
    idx = jnp.arange(_LANE)
    return (idx[:, None] // d == idx[None, :] // d).astype(jnp.float32)


# ------------------------------- wrapper ------------------------------------


def pallas_layer_norm(x, alpha, bias, eps=1e-6):
    """alpha * (x - mean) / (std_unbiased + eps) + bias over the last axis."""
    orig_shape = x.shape
    d = orig_shape[-1]
    x2 = x.reshape(-1, d)
    m = x2.shape[0]
    itemsize = jnp.dtype(x.dtype).itemsize
    cfg = _hw_config()

    fold = (d < _LANE) and (_LANE % d == 0) and (m % (_LANE // d) == 0)
    # TODO(synk): for d_model that is neither a multiple of 128 nor a divisor
    # of 128 (with a compatible row count), stores stay masked (vst.msk); pad
    # the feature dim to 128 once at model setup for full lane density.

    if fold:
        k = _LANE // d
        rows, lane_d = m // k, _LANE
        x2 = x2.reshape(rows, _LANE)  # free row-major re-view, keeps element order
        kernel = functools.partial(_ln_folded_kernel, eps=eps, d=d)
        extra_inputs = (_segment_matrix(d),)
        extra_specs = (pl.BlockSpec((_LANE, _LANE), lambda i: (0, 0)),)
        alias_idx = 3
    else:
        rows, lane_d = m, d
        kernel = functools.partial(_ln_rowwise_kernel, eps=eps, d=d)
        extra_inputs = ()
        extra_specs = ()
        alias_idx = 2

    block_rows = _pick_block_rows(rows, lane_d, itemsize, cfg)
    # Partial last block handled by Pallas (masked boundary writes) — no pad.
    grid = (pl.cdiv(rows, block_rows),)

    out = pl.pallas_call(
        kernel,
        out_shape=jax.ShapeDtypeStruct((rows, lane_d), x.dtype),
        grid=grid,
        in_specs=[
            # scalar alpha / bias live in SMEM, shared by every grid step
            pl.BlockSpec(memory_space=pltpu.MemorySpace.SMEM),
            pl.BlockSpec(memory_space=pltpu.MemorySpace.SMEM),
            *extra_specs,
            pl.BlockSpec((block_rows, lane_d), lambda i: (i, 0)),
        ],
        out_specs=pl.BlockSpec((block_rows, lane_d), lambda i: (i, 0)),
        # Output reuses the (dead-after-norm) input HBM buffer.
        input_output_aliases={alias_idx: 0},
        compiler_params=pltpu.CompilerParams(
            dimension_semantics=("parallel",),
            vmem_limit_bytes=cfg["vmem_limit"],
        ),
    )(alpha, bias, *extra_inputs, x2)

    return out.reshape(orig_shape)


# ------------------------------- module -------------------------------------


class Encoder:
    """JAX port of the PyTorch Encoder: apply layers, then LayerNormalization."""

    def __init__(self, layers=()):
        # TODO(synk): `layers` are externally supplied nn.Modules in the
        # reference; here they are plain JAX callables (default: none). For the
        # largest absolute win, fuse this LayerNorm into the last layer's
        # residual-add epilogue instead of running it as a standalone pass.
        self.layers = list(layers)
        self.eps = 1e-6
        # LayerNormalization params: alpha = ones(1), bias = zeros(1)
        self.alpha = jnp.ones((1,), jnp.float32)
        self.bias = jnp.zeros((1,), jnp.float32)

    def __call__(self, x, mask):
        for layer in self.layers:
            x = layer(x, mask)
        return pallas_layer_norm(x, self.alpha, self.bias, self.eps)


def _reference_layer_norm(x, alpha, bias, eps):
    mean = jnp.mean(x, axis=-1, keepdims=True)
    std = jnp.std(x, axis=-1, keepdims=True, ddof=1)  # unbiased, like torch
    return alpha * (x - mean) / (std + eps) + bias


if __name__ == "__main__":
    key = jax.random.PRNGKey(0)
    batch, seq, d_model = 2, 8, 32
    kx, ky = jax.random.split(key)
    x = jax.random.normal(kx, (batch, seq, d_model), dtype=jnp.float32)
    mask = jnp.ones((batch, 1, seq, seq), dtype=jnp.float32)  # passed to layers

    enc = Encoder(layers=())
    out = jax.block_until_ready(enc(x, mask))  # lane-folded (d=32) path

    ref = _reference_layer_norm(x, enc.alpha[0], enc.bias[0], enc.eps)
    assert out.shape == x.shape
    assert jnp.allclose(out, ref, atol=1e-3, rtol=1e-3), "mismatch vs reference"

    # Second case: row count not divisible by the lane-fold factor -> exercises
    # the rowwise fallback path (single full-extent block, no padding).
    x_odd = jax.random.normal(ky, (3, 5, d_model), dtype=jnp.float32)
    mask_odd = jnp.ones((3, 1, 5, 5), dtype=jnp.float32)
    out_odd = jax.block_until_ready(enc(x_odd, mask_odd))
    ref_odd = _reference_layer_norm(x_odd, enc.alpha[0], enc.bias[0], enc.eps)
    assert out_odd.shape == x_odd.shape
    assert jnp.allclose(out_odd, ref_odd, atol=1e-3, rtol=1e-3), "tail mismatch"

    print("KERNEL_OK")
</pallas_src>

<mosaic_0001>
module attributes {stable_mosaic.version = 11 : i64} {
  func.func @_ln_folded_kernel(%arg0: i32, %arg1: memref<1xf32, #tpu.memory_space<smem>>, %arg2: memref<1xf32, #tpu.memory_space<smem>>, %arg3: memref<128x128xf32, #tpu.memory_space<vmem>>, %arg4: memref<4x128xf32, #tpu.memory_space<vmem>>, %arg5: memref<4x128xf32, #tpu.memory_space<vmem>>) attributes {dimension_semantics = [#tpu.dimension_semantics<parallel>], iteration_bounds = array<i64: 1>, scalar_prefetch = 0 : i64, scratch_operands = 0 : i64, tpu.core_type = #tpu.core_type<tc>, window_params = [{transform_indices = @transform_0, window_bounds = array<i64: 1>}, {transform_indices = @transform_1, window_bounds = array<i64: 1>}, {pipeline_mode = #tpu.pipeline_mode<synchronous>, transform_indices = @transform_2, window_bounds = array<i64: 128, 128>}, {transform_indices = @transform_3, window_bounds = array<i64: 4, 128>}, {transform_indices = @transform_4, window_bounds = array<i64: 4, 128>}]} {
    %c0 = arith.constant 0 : index
    %c0_0 = arith.constant 0 : index
    %0 = vector.load %arg4[%c0, %c0_0] : memref<4x128xf32, #tpu.memory_space<vmem>>, vector<4x128xf32>
    %c0_1 = arith.constant 0 : index
    %c0_2 = arith.constant 0 : index
    %1 = vector.load %arg3[%c0_1, %c0_2] : memref<128x128xf32, #tpu.memory_space<vmem>>, vector<128x128xf32>
    %cst = arith.constant dense<0.000000e+00> : vector<4x128xf32>
    %2 = tpu.matmul %0, %1, %cst {dimension_numbers = #tpu.dot_dimension_numbers<[1], [0], [0], [1], [0, 0, 1, 1], [], []>} : vector<4x128xf32>, vector<128x128xf32>, vector<4x128xf32> -> vector<4x128xf32>
    %cst_3 = arith.constant 3.125000e-02 : f32
    %3 = vector.broadcast %cst_3 : f32 to vector<4x128xf32>
    %4 = arith.mulf %2, %3 : vector<4x128xf32>
    %5 = arith.subf %0, %4 : vector<4x128xf32>
    %6 = arith.mulf %5, %5 : vector<4x128xf32>
    %cst_4 = arith.constant dense<0.000000e+00> : vector<4x128xf32>
    %7 = tpu.matmul %6, %1, %cst_4 {dimension_numbers = #tpu.dot_dimension_numbers<[1], [0], [0], [1], [0, 0, 1, 1], [], []>} : vector<4x128xf32>, vector<128x128xf32>, vector<4x128xf32> -> vector<4x128xf32>
    %cst_5 = arith.constant 0.0322580636 : f32
    %8 = vector.broadcast %cst_5 : f32 to vector<4x128xf32>
    %9 = arith.mulf %7, %8 : vector<4x128xf32>
    %cst_6 = arith.constant 0.000000e+00 : f32
    %10 = vector.broadcast %cst_6 : f32 to vector<4x128xf32>
    %11 = arith.maximumf %9, %10 : vector<4x128xf32>
    %12 = math.sqrt %11 : vector<4x128xf32>
    %c0_7 = arith.constant 0 : index
    %13 = memref.load %arg1[%c0_7] : memref<1xf32, #tpu.memory_space<smem>>
    %cst_8 = arith.constant 9.99999997E-7 : f32
    %14 = vector.broadcast %cst_8 : f32 to vector<4x128xf32>
    %15 = arith.addf %12, %14 : vector<4x128xf32>
    %16 = tpu.reciprocal %15 : vector<4x128xf32> -> vector<4x128xf32>
    %17 = vector.broadcast %13 : f32 to vector<4x128xf32>
    %18 = arith.mulf %17, %16 : vector<4x128xf32>
    %19 = arith.mulf %5, %18 : vector<4x128xf32>
    %c0_9 = arith.constant 0 : index
    %20 = memref.load %arg2[%c0_9] : memref<1xf32, #tpu.memory_space<smem>>
    %21 = vector.broadcast %20 : f32 to vector<4x128xf32>
    %22 = arith.addf %19, %21 : vector<4x128xf32>
    %c0_10 = arith.constant 0 : index
    %c0_11 = arith.constant 0 : index
    %23 = vector.load %arg5[%c0_10, %c0_11] : memref<4x128xf32, #tpu.memory_space<vmem>>, vector<4x128xf32>
    tpu.vector_store %arg5[%c0_10, %c0_11], %22 {strides = array<i32>} : memref<4x128xf32, #tpu.memory_space<vmem>>, vector<4x128xf32>,
    return
  }
  func.func @transform_0(%arg0: i32) -> i32 {
    %c0_i32 = arith.constant 0 : i32
    %c0_i32_0 = arith.constant 0 : i32
    return %c0_i32 : i32
  }
  func.func @transform_1(%arg0: i32) -> i32 {
    %c0_i32 = arith.constant 0 : i32
    %c0_i32_0 = arith.constant 0 : i32
    return %c0_i32 : i32
  }
  func.func @transform_2(%arg0: i32) -> (i32, i32) {
    %c0_i32 = arith.constant 0 : i32
    %c0_i32_0 = arith.constant 0 : i32
    %c0_i32_1 = arith.constant 0 : i32
    return %c0_i32, %c0_i32_0 : i32, i32
  }
  func.func @transform_3(%arg0: i32) -> (i32, i32) {
    %c0_i32 = arith.constant 0 : i32
    %c0_i32_0 = arith.constant 0 : i32
    return %arg0, %c0_i32 : i32, i32
  }
  func.func @transform_4(%arg0: i32) -> (i32, i32) {
    %c0_i32 = arith.constant 0 : i32
    %c0_i32_0 = arith.constant 0 : i32
    return %arg0, %c0_i32 : i32, i32
  }
}

</mosaic_0001>

<bundles_post_ra>
// kernel: tpu_custom_call.1
= control target key start
LH: loop header
LB: loop body
LE: loop exit
PB: predicated region body
PF: predicated region fallthrough
CT: control target
= control target key end

     0   :  { %11 = vsyncpa [#allocation5], 0  ;;  %s552_s0 = inlined_call_operand.<no memory space> [shape: f32[1], index: 0, kind: input, shape index: {}]   ;;  %s553_s1 = inlined_call_operand.<no memory space> [shape: f32[1], index: 1, kind: input, shape index: {}]   ;;  %s554_s2 = inlined_call_operand.hbm [shape: f32[128,128], index: 2, kind: input, shape index: {}]   ;;  %s555_s3 = inlined_call_operand.hbm [shape: f32[4,128], index: 3, kind: input, shape index: {}, may-alias: {3,4}]   ;;  %s556_s4 = inlined_call_operand.hbm [shape: f32[4,128], index: 4, kind: output, shape index: {}, may-alias: {3,4}]  }
   0x1   :  { %12 = vsyncpa [#allocation8], 0 }
   0x2   :  { %13 = vsyncpa [#allocation6], 0  ;;  %s477_s15 = smov [#allocation4]   ;;  %s405_s19 = scalar_lea.hbm %s554_s2, 2048 }
   0x3   :  { %s23_s16 = sshll.u32 %s477_s15, 4  ;;  %p406_p0 = scmp.ne.s32.totalorder %s554_s2, %s405_s19  ;;  %s24_s16 = int_to_ptr.vmem [resolvable:$true] %s23_s16 }
   0x4   :  { %p409_p1 = scmp.lt.u32.totalorder %s405_s19, %s554_s2 }
   0x6   :  { %p411_p2 = pnand %p409_p1, %p406_p0 }
   0x8   :  { %414 = shalt.err (!%p411_p2)
}
   0x9   :  { %s415_s24 = scalar_lea.vmem %s24_s16, 2048  ;;  %p420_p4 = scmp.lt.s32.totalorder %s24_s16, %s24_s16 }
   0xa   :  { %p416_p3 = scmp.ne.s32.totalorder %s24_s16, %s415_s24  ;;  %p421_p5 = scmp.lt.s32.totalorder %s415_s24, %s415_s24 }
   0xc   :  { %p422_p6 = por %p421_p5, %p420_p4 }
   0xe   :  { %p423_p7 = pnand %p422_p6, %p416_p3 }
  0x10   :  { %426 = shalt.err (!%p423_p7)
}
  0x11   :  { %s478_s25 = smov 128   ;;  %s479_s26 = smov 8  }
  0x12   :  { %29 = dma.hbm_to_vmem [thread:$0]  %s554_s2, 2048, %s24_s16, [#allocation5], %s478_s25, %s478_s25, %s479_s26  }
  0x13   :  { %s480_s29 = smov [#allocation7]   ;;  %s427_s7 = scalar_lea.hbm %s555_s3, 64 }
  0x14   :  { %s36_s30 = sshll.u32 %s480_s29, 4  ;;  %p428_p8 = scmp.ne.s32.totalorder %s555_s3, %s427_s7  ;;  %s37_s30 = int_to_ptr.vmem [resolvable:$true] %s36_s30 }
  0x15   :  { %p431_p9 = scmp.lt.u32.totalorder %s427_s7, %s555_s3 }
  0x17   :  { %p433_p10 = pnand %p431_p9, %p428_p8 }
  0x19   :  { %436 = shalt.err (!%p433_p10)
}
  0x1a   :  { %s437_s12 = scalar_lea.vmem %s37_s30, 64  ;;  %p442_p12 = scmp.lt.s32.totalorder %s37_s30, %s37_s30 }
  0x1b   :  { %p438_p11 = scmp.ne.s32.totalorder %s37_s30, %s437_s12  ;;  %p443_p13 = scmp.lt.s32.totalorder %s437_s12, %s437_s12 }
  0x1d   :  { %p444_p0 = por %p443_p13, %p442_p12 }
  0x1f   :  { %p445_p1 = pnand %p444_p0, %p438_p11 }
  0x21   :  { %448 = shalt.err (!%p445_p1)
}
  0x22   :  { %39 = dma.hbm_to_vmem [thread:$0]  %s555_s3, 64, %s37_s30, [#allocation8]  }
  0x23   :  { %471 = dma.done.wait [#allocation5], 2048  }
  0x24   :  { %472 = vsyncadd [#allocation5], 4294965248 }
  0x25   :  { %473 = dma.done.wait [#allocation8], 64  }
  0x26   :  { %474 = vsyncadd [#allocation8], 4294967232  ;;  %v481_v0 = vmov 0.0|0.0   ;;  %vm482_vm0 = vmmov 0   ;;  %v483_v1 = vmov 0.0   ;;  %v47_v2 = vld [vmem:[#allocation4] sm:$0xff]  ;;  %v218_v42 = vstv %s552_s0 }
  0x27   :  { %345 = vmatprep.subr.bf16.mxu0 %v481_v0  ;;  %307 = vmatprep.mubr.msk.f32.mxu0 %vm482_vm0, %v483_v1  ;;  %v48_v3 = vld [vmem:[#allocation4 + $0x8] sm:$0xff]  ;;  %v49_v4 = vld [vmem:[#allocation4 + $0x10] sm:$0xff]  ;;  %v50_v6 = vld [vmem:[#allocation4 + $0x18] sm:$0xff]  ;;  %v222_v45 = vstv %s553_s1  ;;  %s484_s17 = smov [#allocation9]  }
  0x28   :  { %369 = vmatprep.subr.bf16.mxu1 %v481_v0  ;;  %342 = vmatprep.mubr.msk.f32.mxu1 %vm482_vm0, %v483_v1  ;;  %v346_v5 = vpack.c.bf16 %v48_v3, %v47_v2  ;;  %v349_v7 = vpack.c.bf16 %v50_v6, %v49_v4  ;;  %v51_v8 = vld [vmem:[#allocation4 + $0x20] sm:$0xff]  ;;  %v52_v9 = vld [vmem:[#allocation4 + $0x28] sm:$0xff]  ;;  %v53_v11 = vld [vmem:[#allocation4 + $0x30] sm:$0xff]  ;;  %s231_s18 = sshll.u32 %s484_s17, 4  ;;  %s232_s18 = int_to_ptr.vmem [resolvable:$true] %s231_s18 }
  0x29   :  { %v352_v10 = vpack.c.bf16 %v52_v9, %v51_v8  ;;  %v54_v12 = vld [vmem:[#allocation4 + $0x38] sm:$0xff]  ;;  %v55_v14 = vld [vmem:[#allocation4 + $0x40] sm:$0xff]  ;;  %v56_v15 = vld [vmem:[#allocation4 + $0x48] sm:$0xff]  ;;  %s449_s19 = scalar_lea.vmem %s232_s18, 64  ;;  %p454_p3 = scmp.lt.s32.totalorder %s232_s18, %s232_s18 }
  0x2a   :  { %347 = vmatpush3.bf16.msra.mxu0 %v346_v5  ;;  %371 = vmatpush3.bf16.msra.mxu1 %v346_v5  ;;  %v355_v13 = vpack.c.bf16 %v54_v12, %v53_v11  ;;  %v358_v16 = vpack.c.bf16 %v56_v15, %v55_v14  ;;  %v57_v17 = vld [vmem:[#allocation4 + $0x50] sm:$0xff]  ;;  %v58_v18 = vld [vmem:[#allocation4 + $0x58] sm:$0xff]  ;;  %v59_v20 = vld [vmem:[#allocation4 + $0x60] sm:$0xff]  ;;  %p450_p2 = scmp.ne.s32.totalorder %s232_s18, %s449_s19  ;;  %p455_p4 = scmp.lt.s32.totalorder %s449_s19, %s449_s19 }
  0x2b   :  { %348 = vmatprep.subr.bf16.mxu0 %v481_v0  ;;  %372 = vmatprep.subr.bf16.mxu1 %v481_v0  ;;  %v361_v19 = vpack.c.bf16 %v58_v18, %v57_v17  ;;  %v60_v21 = vld [vmem:[#allocation4 + $0x68] sm:$0xff]  ;;  %v61_v23 = vld [vmem:[#allocation4 + $0x70] sm:$0xff]  ;;  %v62_v24 = vld [vmem:[#allocation4 + $0x78] sm:$0xff] }
  0x2c   :  { %v364_v22 = vpack.c.bf16 %v60_v21, %v59_v20  ;;  %v367_v25 = vpack.c.bf16 %v62_v24, %v61_v23  ;;  %v46_v26 = vld [vmem:[#allocation7] sm:$0xf]  ;;  %p456_p5 = por %p455_p4, %p454_p3 }
  0x2e   :  { %350 = vmatpush3.bf16.msra.mxu0 %v349_v7  ;;  %374 = vmatpush3.bf16.msra.mxu1 %v349_v7  ;;  %p457_p6 = pnand %p456_p5, %p450_p2 }
  0x2f   :  { %351 = vmatprep.subr.bf16.mxu0 %v481_v0  ;;  %375 = vmatprep.subr.bf16.mxu1 %v481_v0 }
  0x32   :  { %353 = vmatpush3.bf16.msra.mxu0 %v352_v10  ;;  %377 = vmatpush3.bf16.msra.mxu1 %v352_v10 }
  0x33   :  { %354 = vmatprep.subr.bf16.mxu0 %v481_v0  ;;  %378 = vmatprep.subr.bf16.mxu1 %v481_v0 }
  0x36   :  { %356 = vmatpush3.bf16.msra.mxu0 %v355_v13  ;;  %380 = vmatpush3.bf16.msra.mxu1 %v355_v13 }
  0x37   :  { %357 = vmatprep.subr.bf16.mxu0 %v481_v0  ;;  %381 = vmatprep.subr.bf16.mxu1 %v481_v0 }
  0x3a   :  { %359 = vmatpush3.bf16.msra.mxu0 %v358_v16  ;;  %383 = vmatpush3.bf16.msra.mxu1 %v358_v16 }
  0x3b   :  { %360 = vmatprep.subr.bf16.mxu0 %v481_v0  ;;  %384 = vmatprep.subr.bf16.mxu1 %v481_v0 }
  0x3e   :  { %362 = vmatpush3.bf16.msra.mxu0 %v361_v19  ;;  %386 = vmatpush3.bf16.msra.mxu1 %v361_v19 }
  0x3f   :  { %363 = vmatprep.subr.bf16.mxu0 %v481_v0  ;;  %387 = vmatprep.subr.bf16.mxu1 %v481_v0 }
  0x42   :  { %365 = vmatpush3.bf16.msra.mxu0 %v364_v22  ;;  %389 = vmatpush3.bf16.msra.mxu1 %v364_v22 }
  0x43   :  { %366 = vmatprep.subr.bf16.mxu0 %v481_v0  ;;  %390 = vmatprep.subr.bf16.mxu1 %v481_v0 }
  0x46   :  { %368 = vmatpush3.bf16.msra.mxu0 %v367_v25  ;;  %392 = vmatpush3.bf16.msra.mxu1 %v367_v25 }
  0x49   :  { %308 = vmatmul.mubr.f32.vlgmr.msra.gmra.mrb[0].mxu0 %v46_v26 }
 0x11c   :  { %v129_v27 = vpop.f32.mrb[0].mxu0 }
 0x11d   :  { %v133_v28 = vmul.f32 0.03125, %v129_v27  ;;  %v309_v29 = vpop.f32.mrb[1].mxu0 }
 0x11f   :  { %v134_v30 = vsub.f32 %v46_v26, %v133_v28 }
 0x121   :  { %v135_v31 = vmul.f32 %v134_v30, %v134_v30 }
 0x123   :  { %343 = vmatmul.mubr.f32.vlgmr.msra.gmra.mrb[0].mxu1 %v135_v31 }
 0x1f6   :  { %v202_v32 = vpop.f32.mrb[0].mxu1 }
 0x1f7   :  { %v206_v33 = vmul.f32 0.032258064, %v202_v32  ;;  %v344_v34 = vpop.f32.mrb[1].mxu1 }
 0x1f9   :  { %v207_v35 = vmax.f32 %v206_v33, 0.0 }
 0x1fb   :  { %401 = vrsqrt.f32 %v207_v35  ;;  %vm210_vm1 = vcmp.eq.f32.partialorder %v207_v35, inf  ;;  %v213_v38 = vand.u32 2147483648, %v207_v35  ;;  %vm212_vm2 = vcmp.eq.f32.partialorder %v207_v35, 0.0 }
 0x205   :  { %v402_v36 = vpop.eup %401 }
 0x206   :  { %v209_v37 = vmul.f32 %v402_v36, %v207_v35 }
 0x208   :  { %v211_v39 = vsel %vm210_vm1, %v207_v35, %v209_v37 }
 0x209   :  { %v214_v40 = vsel %vm212_vm2, %v213_v38, %v211_v39 }
 0x20a   :  { %v216_v41 = vadd.f32 1e-06, %v214_v40 }
 0x20c   :  { %403 = vrcp.f32 %v216_v41 }
 0x216   :  { %v404_v43 = vpop.eup %403 }
 0x217   :  { %v219_v44 = vmul.f32 %v404_v43, %v218_v42 }
 0x219   :  { %v220_v46 = vmul.f32 %v219_v44, %v134_v30 }
 0x21b   :  { %v223_v47 = vadd.f32 %v222_v45, %v220_v46 }
 0x21d   :  { %224 = vst [vmem:[#allocation9] sm:$0xf] %v223_v47 }
 0x21e   :  { %460 = shalt.err (!%p457_p6)
}
 0x21f   :  { %s461_s21 = scalar_lea.hbm %s556_s4, 64 }
 0x220   :  { %p462_p7 = scmp.ne.s32.totalorder %s556_s4, %s461_s21  ;;  %p465_p8 = scmp.lt.u32.totalorder %s461_s21, %s556_s4 }
 0x222   :  { %p467_p9 = pnand %p465_p8, %p462_p7 }
 0x224   :  { %470 = shalt.err (!%p467_p9)
}
 0x225   :  { %234 = dma.vmem_to_hbm [thread:$0]  %s232_s18, 64, %s556_s4, [#allocation6]  }
 0x226   :  { %475 = dma.done.wait [#allocation6], 64  }
 0x227   :  { %476 = vsyncadd [#allocation6], 4294967232 }
 0x228   :  { %238 = vsyncpa [#allocation5], 1 }
 0x229   :  { %239 = vsyncpa [#allocation8], 1 }
 0x22a   :  { %240 = vsyncpa [#allocation6], 1 }

</bundles_post_ra>
